<compile_context>
chip_gen: v5e
topology: v5e:2x2
jax: 0.10.0
libtpu: 0.0.40
codegen_flags: <defaults>
</compile_context>

<pallas_src>
import functools

import jax
import jax.numpy as jnp
from jax.experimental import pallas as pl
from jax.experimental.pallas import tpu as pltpu


_BN_EPS = 1e-5


def _round_up(x, m):
    return ((x + m - 1) // m) * m


def _vmem_capacity_bytes(default=64 * 1024 * 1024):
    try:
        info = pltpu.get_tpu_info()
        return int(getattr(info, "vmem_capacity_bytes", default))
    except Exception:
        return default


def _choose_tile_rows(n, k, dp):
    """Pick the N-tile so double-buffered tiles + resident weight fit comfortably in VMEM."""
    vmem = _vmem_capacity_bytes()
    budget = vmem // 8                      # generous headroom (v7x ~8 MiB, v5e/v6e ~16 MiB)
    fixed = 2 * k * dp * 4                  # (possibly double-buffered) resident weight
    per_row = 4 * (2 * k + 4 * dp)          # double-buffered x / y / out tiles, f32
    avail = max(budget - fixed, per_row * 8)
    tm = max(8, min(1024, avail // per_row))
    tm = (tm // 8) * 8                      # sublane multiple
    if tm >= 256:                           # MXU-friendly (2x256^2 on v6e/v7x)
        tm = (tm // 256) * 256
    return int(min(tm, _round_up(n, 8)))


def _matmul_stats_kernel(x_ref, wt_ref, y_ref, sum_ref, sumsq_ref):
    # Linear (bias dropped: it cancels exactly under training-mode BatchNorm).
    y = jnp.dot(x_ref[...], wt_ref[...], preferred_element_type=jnp.float32)  # MXU
    y_ref[...] = y

    @pl.when(pl.program_id(0) == 0)
    def _init():
        sum_ref[...] = jnp.zeros_like(sum_ref)
        sumsq_ref[...] = jnp.zeros_like(sumsq_ref)

    # Single sweep: partial sum and sum-of-squares, accumulated in f32.
    sum_ref[...] += jnp.sum(y, axis=0, keepdims=True)
    sumsq_ref[...] += jnp.sum(y * y, axis=0, keepdims=True)


def _normalize_kernel(y_ref, sum_ref, sumsq_ref, gamma_ref, beta_ref, o_ref,
                      *, inv_n, eps):
    mean = sum_ref[...] * inv_n                           # [1, Dp]
    var = sumsq_ref[...] * inv_n - mean * mean            # biased variance (train mode)
    scale = gamma_ref[...] * jax.lax.rsqrt(var + eps)     # rsqrt -> EUP slot
    shift = beta_ref[...] - mean * scale
    o_ref[...] = (y_ref[...] * scale + shift).astype(o_ref.dtype)  # one FMA per element


def feature_block(x, w, b, gamma, beta, *, eps=_BN_EPS):
    """x: [N, input_dim]; w: [low_dim, input_dim] (PyTorch layout); b/gamma/beta: [low_dim].

    Training-mode forward of Linear -> BatchNorm1d.  The Linear bias `b` is accepted
    for API parity but is a mathematical no-op under batch-statistics BatchNorm.
    """
    del b  # cancels exactly: (y + b) - mean(y + b) == y - mean(y)
    n, k = x.shape
    d = w.shape[0]

    dp = _round_up(max(d, 128), 128)          # lane-dense feature dim
    tm = _choose_tile_rows(n, k, dp)
    n_pad = _round_up(n, tm)
    n_tiles = n_pad // tm

    f32 = jnp.float32
    # Glue-level padding (zeros in padded rows/cols keep stats exact; see header).
    x_p = jnp.zeros((n_pad, k), f32).at[:n, :].set(x.astype(f32))
    w_t = jnp.zeros((k, dp), f32).at[:, :d].set(jnp.transpose(w).astype(f32))
    g_p = jnp.zeros((1, dp), f32).at[0, :d].set(gamma.astype(f32))
    be_p = jnp.zeros((1, dp), f32).at[0, :d].set(beta.astype(f32))

    vmem_limit = int(min(_vmem_capacity_bytes() // 2, 64 * 1024 * 1024))

    # ---- Pass A: tiled matmul + batch-stat accumulation ---------------------
    y_full, y_sum, y_sumsq = pl.pallas_call(
        _matmul_stats_kernel,
        out_shape=(
            jax.ShapeDtypeStruct((n_pad, dp), f32),
            jax.ShapeDtypeStruct((1, dp), f32),
            jax.ShapeDtypeStruct((1, dp), f32),
        ),
        grid=(n_tiles,),
        in_specs=[
            pl.BlockSpec((tm, k), lambda i: (i, 0)),       # stream x over N
            pl.BlockSpec((k, dp), lambda i: (0, 0)),       # weight resident across grid
        ],
        out_specs=(
            pl.BlockSpec((tm, dp), lambda i: (i, 0)),      # y tile
            pl.BlockSpec((1, dp), lambda i: (0, 0)),       # sum accumulator (resident)
            pl.BlockSpec((1, dp), lambda i: (0, 0)),       # sumsq accumulator (resident)
        ),
        compiler_params=pltpu.CompilerParams(
            dimension_semantics=("arbitrary",),            # accumulation axis
            vmem_limit_bytes=vmem_limit,
        ),
        cost_estimate=pl.CostEstimate(
            flops=2 * n_pad * k * dp + 4 * n_pad * dp,
            transcendentals=0,
            bytes_accessed=4 * (n_pad * k + k * dp + n_pad * dp + 2 * dp),
        ),
    )(x_p, w_t)

    # ---- Pass B: fused BN epilogue (out = y*scale + shift) -------------------
    out_full = pl.pallas_call(
        functools.partial(_normalize_kernel, inv_n=1.0 / n, eps=eps),
        out_shape=jax.ShapeDtypeStruct((n_pad, dp), f32),
        grid=(n_tiles,),
        in_specs=[
            pl.BlockSpec((tm, dp), lambda i: (i, 0)),      # stream y over N
            pl.BlockSpec((1, dp), lambda i: (0, 0)),       # sum (resident)
            pl.BlockSpec((1, dp), lambda i: (0, 0)),       # sumsq (resident)
            pl.BlockSpec((1, dp), lambda i: (0, 0)),       # gamma (resident)
            pl.BlockSpec((1, dp), lambda i: (0, 0)),       # beta (resident)
        ],
        out_specs=pl.BlockSpec((tm, dp), lambda i: (i, 0)),
        compiler_params=pltpu.CompilerParams(
            dimension_semantics=("parallel",),             # megacore shard on v7x
            vmem_limit_bytes=vmem_limit,
        ),
        cost_estimate=pl.CostEstimate(
            flops=2 * n_pad * dp + 8 * dp,
            transcendentals=dp,
            bytes_accessed=4 * (2 * n_pad * dp + 4 * dp),
        ),
    )(y_full, y_sum, y_sumsq, g_p, be_p)

    # Strip padding (glue).
    return out_full[:n, :d]


def init_params(key, input_dim, low_dim):
    """Deterministic re-implementation of weights_init_kaiming for Linear + BatchNorm1d."""
    k_w, k_bn = jax.random.split(key)
    # Linear: kaiming_normal_(mode='fan_out', a=0) -> std = sqrt(2 / fan_out) = sqrt(2 / low_dim)
    w = jax.random.normal(k_w, (low_dim, input_dim), jnp.float32) * jnp.sqrt(2.0 / low_dim)
    b = jnp.zeros((low_dim,), jnp.float32)
    # BatchNorm1d: weight ~ N(1.0, 0.02), bias = 0
    gamma = 1.0 + 0.02 * jax.random.normal(k_bn, (low_dim,), jnp.float32)
    beta = jnp.zeros((low_dim,), jnp.float32)
    return w, b, gamma, beta


if __name__ == "__main__":
    key = jax.random.PRNGKey(0)
    k_x, k_p = jax.random.split(key)

    N, INPUT_DIM, LOW_DIM = 8, 32, 16
    x = jax.random.normal(k_x, (N, INPUT_DIM), jnp.float32)
    w, b, gamma, beta = init_params(k_p, INPUT_DIM, LOW_DIM)

    out = feature_block(x, w, b, gamma, beta)
    out = jax.block_until_ready(out)

    # Pure-JAX reference (training-mode BatchNorm1d: batch mean, biased var, eps=1e-5).
    y_ref = x @ w.T + b
    mean = y_ref.mean(axis=0, keepdims=True)
    var = ((y_ref - mean) ** 2).mean(axis=0, keepdims=True)
    ref = (y_ref - mean) / jnp.sqrt(var + 1e-5) * gamma + beta
    assert out.shape == ref.shape, f"shape mismatch {out.shape} vs {ref.shape}"
    assert jnp.allclose(out, ref, atol=1e-4, rtol=1e-4), "mismatch vs reference"

    print("KERNEL_OK")
</pallas_src>

<mosaic_0001>
module attributes {stable_mosaic.version = 11 : i64} {
  func.func @_matmul_stats_kernel(%arg0: i32, %arg1: memref<8x32xf32, #tpu.memory_space<vmem>>, %arg2: memref<32x128xf32, #tpu.memory_space<vmem>>, %arg3: memref<8x128xf32, #tpu.memory_space<vmem>>, %arg4: memref<1x128xf32, #tpu.memory_space<vmem>>, %arg5: memref<1x128xf32, #tpu.memory_space<vmem>>) attributes {dimension_semantics = [#tpu.dimension_semantics<arbitrary>], iteration_bounds = array<i64: 1>, scalar_prefetch = 0 : i64, scratch_operands = 0 : i64, tpu.core_type = #tpu.core_type<tc>, window_params = [{transform_indices = @transform_0, window_bounds = array<i64: 8, 32>}, {pipeline_mode = #tpu.pipeline_mode<synchronous>, transform_indices = @transform_1, window_bounds = array<i64: 32, 128>}, {transform_indices = @transform_2, window_bounds = array<i64: 8, 128>}, {pipeline_mode = #tpu.pipeline_mode<synchronous>, transform_indices = @transform_3, window_bounds = array<i64: 1, 128>}, {pipeline_mode = #tpu.pipeline_mode<synchronous>, transform_indices = @transform_4, window_bounds = array<i64: 1, 128>}]} {
    %c0 = arith.constant 0 : index
    %c0_0 = arith.constant 0 : index
    %0 = vector.load %arg1[%c0, %c0_0] : memref<8x32xf32, #tpu.memory_space<vmem>>, vector<8x32xf32>
    %c0_1 = arith.constant 0 : index
    %c0_2 = arith.constant 0 : index
    %1 = vector.load %arg2[%c0_1, %c0_2] : memref<32x128xf32, #tpu.memory_space<vmem>>, vector<32x128xf32>
    %cst = arith.constant dense<0.000000e+00> : vector<8x128xf32>
    %2 = tpu.matmul %0, %1, %cst {dimension_numbers = #tpu.dot_dimension_numbers<[1], [0], [0], [1], [0, 0, 1, 1], [], []>} : vector<8x32xf32>, vector<32x128xf32>, vector<8x128xf32> -> vector<8x128xf32>
    %c0_3 = arith.constant 0 : index
    %c0_4 = arith.constant 0 : index
    %3 = vector.load %arg3[%c0_3, %c0_4] : memref<8x128xf32, #tpu.memory_space<vmem>>, vector<8x128xf32>
    tpu.vector_store %arg3[%c0_3, %c0_4], %2 {strides = array<i32>} : memref<8x128xf32, #tpu.memory_space<vmem>>, vector<8x128xf32>,
    %c0_i32 = arith.constant 0 : i32
    %4 = arith.cmpi eq, %arg0, %c0_i32 : i32
    %5 = arith.extui %4 : i1 to i32
    %c0_i32_5 = arith.constant 0 : i32
    %6 = arith.cmpi ne, %5, %c0_i32_5 : i32
    scf.if %6 {
      %cst_16 = arith.constant 0.000000e+00 : f32
      %18 = vector.broadcast %cst_16 : f32 to vector<1x128xf32>
      %c0_17 = arith.constant 0 : index
      %c0_18 = arith.constant 0 : index
      %19 = vector.load %arg4[%c0_17, %c0_18] : memref<1x128xf32, #tpu.memory_space<vmem>>, vector<1x128xf32>
      tpu.vector_store %arg4[%c0_17, %c0_18], %18 {strides = array<i32>} : memref<1x128xf32, #tpu.memory_space<vmem>>, vector<1x128xf32>,
      %cst_19 = arith.constant 0.000000e+00 : f32
      %20 = vector.broadcast %cst_19 : f32 to vector<1x128xf32>
      %c0_20 = arith.constant 0 : index
      %c0_21 = arith.constant 0 : index
      %21 = vector.load %arg5[%c0_20, %c0_21] : memref<1x128xf32, #tpu.memory_space<vmem>>, vector<1x128xf32>
      tpu.vector_store %arg5[%c0_20, %c0_21], %20 {strides = array<i32>} : memref<1x128xf32, #tpu.memory_space<vmem>>, vector<1x128xf32>,
    } else {
    }
    %c0_6 = arith.constant 0 : index
    %c0_7 = arith.constant 0 : index
    %7 = vector.load %arg4[%c0_6, %c0_7] : memref<1x128xf32, #tpu.memory_space<vmem>>, vector<1x128xf32>
    %cst_8 = arith.constant dense<0.000000e+00> : vector<128xf32>
    %8 = vector.multi_reduction <add>, %2, %cst_8 [0] : vector<8x128xf32> to vector<128xf32>
    %9 = vector.shape_cast %8 : vector<128xf32> to vector<1x128xf32>
    %10 = arith.addf %7, %9 : vector<1x128xf32>
    %c0_9 = arith.constant 0 : index
    %c0_10 = arith.constant 0 : index
    %11 = vector.load %arg4[%c0_9, %c0_10] : memref<1x128xf32, #tpu.memory_space<vmem>>, vector<1x128xf32>
    tpu.vector_store %arg4[%c0_9, %c0_10], %10 {strides = array<i32>} : memref<1x128xf32, #tpu.memory_space<vmem>>, vector<1x128xf32>,
    %c0_11 = arith.constant 0 : index
    %c0_12 = arith.constant 0 : index
    %12 = vector.load %arg5[%c0_11, %c0_12] : memref<1x128xf32, #tpu.memory_space<vmem>>, vector<1x128xf32>
    %13 = arith.mulf %2, %2 : vector<8x128xf32>
    %cst_13 = arith.constant dense<0.000000e+00> : vector<128xf32>
    %14 = vector.multi_reduction <add>, %13, %cst_13 [0] : vector<8x128xf32> to vector<128xf32>
    %15 = vector.shape_cast %14 : vector<128xf32> to vector<1x128xf32>
    %16 = arith.addf %12, %15 : vector<1x128xf32>
    %c0_14 = arith.constant 0 : index
    %c0_15 = arith.constant 0 : index
    %17 = vector.load %arg5[%c0_14, %c0_15] : memref<1x128xf32, #tpu.memory_space<vmem>>, vector<1x128xf32>
    tpu.vector_store %arg5[%c0_14, %c0_15], %16 {strides = array<i32>} : memref<1x128xf32, #tpu.memory_space<vmem>>, vector<1x128xf32>,
    return
  }
  func.func @transform_0(%arg0: i32) -> (i32, i32) {
    %c0_i32 = arith.constant 0 : i32
    %c0_i32_0 = arith.constant 0 : i32
    return %arg0, %c0_i32 : i32, i32
  }
  func.func @transform_1(%arg0: i32) -> (i32, i32) {
    %c0_i32 = arith.constant 0 : i32
    %c0_i32_0 = arith.constant 0 : i32
    %c0_i32_1 = arith.constant 0 : i32
    return %c0_i32, %c0_i32_0 : i32, i32
  }
  func.func @transform_2(%arg0: i32) -> (i32, i32) {
    %c0_i32 = arith.constant 0 : i32
    %c0_i32_0 = arith.constant 0 : i32
    return %arg0, %c0_i32 : i32, i32
  }
  func.func @transform_3(%arg0: i32) -> (i32, i32) {
    %c0_i32 = arith.constant 0 : i32
    %c0_i32_0 = arith.constant 0 : i32
    %c0_i32_1 = arith.constant 0 : i32
    return %c0_i32, %c0_i32_0 : i32, i32
  }
  func.func @transform_4(%arg0: i32) -> (i32, i32) {
    %c0_i32 = arith.constant 0 : i32
    %c0_i32_0 = arith.constant 0 : i32
    %c0_i32_1 = arith.constant 0 : i32
    return %c0_i32, %c0_i32_0 : i32, i32
  }
}

</mosaic_0001>

<bundles_post_ra>
// kernel: tpu_custom_call.1
= control target key start
LH: loop header
LB: loop body
LE: loop exit
PB: predicated region body
PF: predicated region fallthrough
CT: control target
= control target key end

     0   :  { %10 = vsyncpa [#allocation3], 0  ;;  %s335_s0 = inlined_call_operand.hbm [shape: f32[8,32], index: 0, kind: input, shape index: {}]   ;;  %s336_s1 = inlined_call_operand.hbm [shape: f32[32,128], index: 1, kind: input, shape index: {}]   ;;  %s337_s2 = inlined_call_operand.hbm [shape: f32[8,128], index: 2, kind: output, shape index: {0}]   ;;  %s338_s3 = inlined_call_operand.hbm [shape: f32[1,128], index: 3, kind: output, shape index: {1}]   ;;  %s339_s4 = inlined_call_operand.hbm [shape: f32[1,128], index: 4, kind: output, shape index: {2}]  }
   0x1   :  { %11 = vsyncpa [#allocation6], 0 }
   0x2   :  { %12 = vsyncpa [#allocation4], 0 }
   0x3   :  { %13 = vsyncpa [#allocation9], 0  ;;  %s19_s17 = sshll.u32 %s335_s0, 4  ;;  %s287_s18 = smov [#allocation2]   ;;  %s20_s17 = int_to_ptr.hbm [resolvable:$true] %s19_s17 }
   0x4   :  { %s21_s19 = sshll.u32 %s287_s18, 4  ;;  %s29_s22 = sshll.u32 %s336_s1, 4  ;;  %s22_s19 = int_to_ptr.vmem [resolvable:$true] %s21_s19  ;;  %s30_s22 = int_to_ptr.hbm [resolvable:$true] %s29_s22 }
   0x5   :  { %24 = dma.hbm_to_vmem [thread:$0]  %s20_s17, 128, %s22_s19, [#allocation3]  }
   0x6   :  { %s288_s23 = smov [#allocation5]   ;;  %s289_s25 = smov 128  }
   0x7   :  { %s31_s24 = sshll.u32 %s288_s23, 4  ;;  %s290_s26 = smov 8   ;;  %s32_s24 = int_to_ptr.vmem [resolvable:$true] %s31_s24 }
   0x8   :  { %37 = dma.hbm_to_vmem [thread:$0]  %s30_s22, 512, %s32_s24, [#allocation6], %s289_s25, %s289_s25, %s290_s26  }
   0x9   :  { %279 = dma.done.wait [#allocation3], 128  }
   0xa   :  { %280 = vsyncadd [#allocation3], 4294967168 }
   0xb   :  { %281 = dma.done.wait [#allocation6], 512  }
   0xc   :  { %282 = vsyncadd [#allocation6], 4294966784  ;;  %v50_v0 = vld [vmem:[#allocation5 + $0x18] sm:$0xff]  ;;  %v49_v1 = vld [vmem:[#allocation5 + $0x10] sm:$0xff]  ;;  %vm51_vm0 = vcmask 261120   ;;  %v291_v5 = vmov 0.0  }
   0xd   :  { %67 = vmatpush.msra.mxu0 %v50_v0  ;;  %v48_v2 = vld [vmem:[#allocation5 + $0x8] sm:$0xff]  ;;  %v47_v3 = vld [vmem:[#allocation5] sm:$0xff]  ;;  %v46_v4 = vld [vmem:[#allocation2] sm:$0xff]  ;;  %80 = vst [vmem:[#allocation8] sm:$0x1] %v291_v5  ;;  %s292_s0 = smov [#allocation7]  }
   0xe   :  { %81 = vst [vmem:[#allocation10] sm:$0x1] %v291_v5  ;;  %s106_s1 = sshll.u32 %s292_s0, 4  ;;  %s108_s29 = sshll.u32 %s337_s2, 4  ;;  %s107_s1 = int_to_ptr.vmem [resolvable:$true] %s106_s1  ;;  %s109_s29 = int_to_ptr.hbm [resolvable:$true] %s108_s29 }
   0xf   :  { %68 = vmatpush.msra.mxu0 %v49_v1  ;;  %s293_s30 = smov [#allocation8]   ;;  %s119_s7 = sshll.u32 %s338_s3, 4  ;;  %s120_s7 = int_to_ptr.hbm [resolvable:$true] %s119_s7 }
  0x10   :  { %s117_s5 = sshll.u32 %s293_s30, 4  ;;  %s294_s8 = smov [#allocation10]   ;;  %s118_s5 = int_to_ptr.vmem [resolvable:$true] %s117_s5 }
  0x11   :  { %69 = vmatpush.msra.mxu0 %v48_v2  ;;  %s128_s9 = sshll.u32 %s294_s8, 4  ;;  %s130_s12 = sshll.u32 %s339_s4, 4  ;;  %s129_s9 = int_to_ptr.vmem [resolvable:$true] %s128_s9  ;;  %s131_s12 = int_to_ptr.hbm [resolvable:$true] %s130_s12 }
  0x13   :  { %70 = vmatpush.msra.mxu0 %v47_v3 }
  0x14   :  { %150 = vmatmul.msk.f32.vlgmr.msra.gmra.mxu0 %vm51_vm0, %v46_v4  ;;  %v82_v17 = vld [vmem:[#allocation8] sm:$0x1] }
  0x15   :  { %v91_v20 = vld [vmem:[#allocation10] sm:$0x1] }
  0x91   :  { %v72_v6 = vpop.f32.mrf.mxu0 }
  0x92   :  { %v83_v7 = vrot.slane %v72_v6, 4  ;;  %v92_v8 = vmul.f32 %v72_v6, %v72_v6  ;;  %75 = vst [vmem:[#allocation7] sm:$0xff] %v72_v6 }
  0x93   :  { %111 = dma.vmem_to_hbm [thread:$0]  %s107_s1, 128, %s109_s29, [#allocation4]  }
  0x94   :  { %v84_v9 = vadd.f32 %v83_v7, %v72_v6  ;;  %v93_v10 = vrot.slane %v92_v8, 4 }
  0x96   :  { %v85_v11 = vrot.slane %v84_v9, 2  ;;  %v94_v12 = vadd.f32 %v93_v10, %v92_v8 }
  0x98   :  { %v86_v13 = vadd.f32 %v85_v11, %v84_v9  ;;  %v95_v14 = vrot.slane %v94_v12, 2 }
  0x9a   :  { %v87_v15 = vrot.slane %v86_v13, 1  ;;  %v96_v16 = vadd.f32 %v95_v14, %v94_v12 }
  0x9c   :  { %v88_v18 = vadd.f32 %v87_v15, %v86_v13  ;;  %v97_v19 = vrot.slane %v96_v16, 1 }
  0x9e   :  { %v98_v21 = vadd.f32 %v97_v19, %v96_v16  ;;  %v89_v22 = vadd.f32 %v88_v18, %v82_v17 }
  0xa0   :  { %90 = vst [vmem:[#allocation8] sm:$0x1] %v89_v22  ;;  %v99_v23 = vadd.f32 %v98_v21, %v91_v20 }
  0xa1   :  { %122 = dma.vmem_to_hbm [thread:$0]  %s118_s5, 16, %s120_s7, [#allocation9]  }
  0xa2   :  { %100 = vst [vmem:[#allocation10] sm:$0x1] %v99_v23 }
  0xa3   :  { %133 = dma.vmem_to_hbm [thread:$0]  %s129_s9, 16, %s131_s12, [#allocation9]  }
  0xa4   :  { %283 = dma.done.wait [#allocation4], 128  }
  0xa5   :  { %284 = vsyncadd [#allocation4], 4294967168 }
  0xa6   :  { %285 = dma.done.wait [#allocation9], 32  }
  0xa7   :  { %286 = vsyncadd [#allocation9], 4294967264 }
  0xa8   :  { %146 = vsyncpa [#allocation3], 1 }
  0xa9   :  { %147 = vsyncpa [#allocation6], 1 }
  0xaa   :  { %148 = vsyncpa [#allocation4], 1 }
  0xab   :  { %149 = vsyncpa [#allocation9], 1 }

</bundles_post_ra>
